<compile_context>
chip_gen: v7x
topology: tpu7x:2x2x1
jax: 0.10.0
libtpu: 0.0.40
codegen_flags: <defaults>
</compile_context>

<pallas_src>
import functools

import jax
import jax.numpy as jnp
from jax.experimental import pallas as pl
from jax.experimental.pallas import tpu as pltpu


# ------------------------------- kernels ------------------------------------

def _pool_kernel(x_ref, y_ref, *, inv_hw):
    # x_ref: (1, bC, bHW); y_ref: (1, bC, 1) f32.  The output block index is the same
    # for every spatial grid step, so y_ref stays VMEM-resident and doubles as the
    # accumulator; it is normalized by the FULL H*W on the last step.
    h = pl.program_id(2)

    @pl.when(h == 0)
    def _():
        y_ref[...] = jnp.zeros_like(y_ref)

    y_ref[...] += jnp.sum(x_ref[...], axis=-1, dtype=jnp.float32, keepdims=True)

    @pl.when(h == pl.num_programs(2) - 1)
    def _():
        y_ref[...] *= inv_hw


def _scale_kernel(x_ref, s_ref, o_ref):
    # x_ref: (1, bC, bHW), s_ref: (1, bC, 1) already in the multiply dtype,
    # o_ref: (1, bC, bHW).  The gate was cast once outside the streaming loop, so
    # there is no per-tile VALU cast here (the final astype is a no-op for f32/bf16).
    o_ref[...] = (x_ref[...] * s_ref[...]).astype(o_ref.dtype)


# ------------------------------ tile planning --------------------------------

def _sublane_pack(dtype):
    # Sublane rows per vreg: 8 for 32-bit, 16 for 16-bit, 32 for 8-bit dtypes.
    return 8 * max(1, 4 // jnp.dtype(dtype).itemsize)


def _vmem_budget():
    """Generation-aware (per_tile_budget, vmem_limit) in bytes."""
    try:
        cap = int(pltpu.get_tpu_info().vmem_capacity_bytes)
    except Exception:
        cap = 64 << 20                        # conservative: v7x per-TensorCore VMEM
    tile_budget = min(8 << 20, cap // 16)     # 8 MiB on v5e/v6e, 4 MiB on v7x
    # The scale pass keeps ~4 live tiles (2x input + 2x output, double-buffered)
    # plus the tiny gate vector; leave generous slack under the scoped limit.
    vmem_limit = int(min(6 * tile_budget, cap // 2))
    return tile_budget, vmem_limit


def _plan_tiles(B, C, HW, dtype, budget_bytes):
    """Pick (bC, bHW): bC a sublane-aligned divisor of C (or C itself), bHW a divisor
    of HW (128-aligned when possible), with one tile <= budget_bytes and, whenever
    possible, at least two parallel blocks so both v7x TensorCores get work."""
    itemsize = jnp.dtype(dtype).itemsize
    sub = _sublane_pack(dtype)
    want_blocks = 2 if B == 1 else 1

    def fits(bc, bhw):
        return bc * bhw * itemsize <= budget_bytes

    c_divs = [bc for bc in range(sub, C, sub) if C % bc == 0] + [C]

    # Preferred: full spatial extent per tile, split channels only.
    full_hw = [bc for bc in c_divs if fits(bc, HW)]
    good = [bc for bc in full_hw if (C // bc) >= want_blocks]
    if good:
        return max(good), HW
    if full_hw:
        return max(full_hw), HW

    # Fallback: even the smallest legal channel block exceeds the budget (huge H*W,
    # or C has no sublane-aligned divisor) -> tile the spatial (lane) axis too.
    bC = min(c_divs)
    cand = [h for h in range(128, HW, 128) if HW % h == 0 and fits(bC, h)]
    if not cand:
        cand = [h for h in range(1, HW) if HW % h == 0 and fits(bC, h)]
    if cand:
        return bC, max(cand)
    return bC, HW   # pathological (e.g. C=1, enormous prime HW); still correct.


# ------------------------------- wrapper ------------------------------------

def se_layer(x_nchw, w1, w2):
    """x_nchw: (B, C, H, W); w1: (C, C//r); w2: (C//r, C). Returns (B, C, H, W)."""
    B, C, H, W = x_nchw.shape
    HW = H * W
    x = x_nchw.reshape(B, C, HW)                  # free reshape: HW lands on lanes
    itemsize = jnp.dtype(x.dtype).itemsize

    tile_budget, vmem_limit = _vmem_budget()
    bC, bHW = _plan_tiles(B, C, HW, x.dtype, tile_budget)
    nC, nHW = C // bC, HW // bHW
    grid = (B, nC, nHW)

    # TODO(synk): on v7x, sweep pipeline_mode=pl.Buffered(3) on x_spec (input side
    # only) if xprof shows exposed DMA gaps at small tiles.
    x_spec = pl.BlockSpec((1, bC, bHW), lambda b, c, h: (b, c, h))
    vec_spec = pl.BlockSpec((1, bC, 1), lambda b, c, h: (b, c, 0))

    pool_params = pltpu.CompilerParams(
        dimension_semantics=("parallel", "parallel", "arbitrary"),
        vmem_limit_bytes=vmem_limit)
    scale_params = pltpu.CompilerParams(
        dimension_semantics=("parallel", "parallel", "parallel"),
        vmem_limit_bytes=vmem_limit)

    # 1) Squeeze: spatial mean, streamed & pipelined, f32 accumulation.
    y = pl.pallas_call(
        functools.partial(_pool_kernel, inv_hw=1.0 / HW),
        out_shape=jax.ShapeDtypeStruct((B, C, 1), jnp.float32),
        grid=grid,
        in_specs=[x_spec],
        out_specs=vec_spec,
        compiler_params=pool_params,
        cost_estimate=pl.CostEstimate(
            flops=B * C * HW, transcendentals=0,
            bytes_accessed=B * C * HW * itemsize + B * C * 4),
    )(x)

    # 2) Excitation: (B,C)@(C,C/r) matmuls far below MXU granularity, on the serial
    #    path between the two streaming passes -> plain jnp/XLA, no kernel launch.
    #    Cast the gate ONCE here to the multiply dtype; for sub-16-bit activations
    #    keep it f32 and let the scale kernel cast the product instead.
    gate_dtype = x.dtype if jnp.dtype(x.dtype).itemsize >= 2 else jnp.float32
    yf = y.reshape(B, C)                                        # already f32
    hidden = jnp.maximum(yf @ w1.astype(jnp.float32), 0.0)
    s = jax.nn.sigmoid(hidden @ w2.astype(jnp.float32)).astype(gate_dtype)

    # 3) Scale: stream x again (native dtype), lane-dense output, broadcast multiply.
    out = pl.pallas_call(
        _scale_kernel,
        out_shape=jax.ShapeDtypeStruct((B, C, HW), x.dtype),
        grid=grid,
        in_specs=[x_spec, vec_spec],
        out_specs=x_spec,
        compiler_params=scale_params,
        cost_estimate=pl.CostEstimate(
            flops=B * C * HW, transcendentals=0,
            bytes_accessed=2 * B * C * HW * itemsize
                           + B * C * jnp.dtype(gate_dtype).itemsize),
    )(x, s.reshape(B, C, 1))

    return out.reshape(B, C, H, W)


# ------------------------------ reference -----------------------------------

def reference_se(x, w1, w2):
    y = jnp.mean(x, axis=(2, 3))                      # (B, C)
    h = jnp.maximum(y @ w1, 0.0)                      # (B, Cr)
    s = jax.nn.sigmoid(h @ w2)                        # (B, C)
    return x * s[:, :, None, None]


if __name__ == "__main__":
    B, C, H, W = 2, 64, 16, 16          # HW = 256: lane-dense (multiple of 128)
    reduction = 16
    Cr = C // reduction

    key = jax.random.PRNGKey(0)
    kx, k1, k2 = jax.random.split(key, 3)

    x = jax.random.normal(kx, (B, C, H, W), dtype=jnp.float32)
    # fc1: Linear(C, C//r, bias=False) -> stored transposed as (C, Cr) for y @ w1
    # fc2: Linear(C//r, C, bias=False) -> stored transposed as (Cr, C) for h @ w2
    w1 = jax.random.normal(k1, (C, Cr), dtype=jnp.float32) * 0.1
    w2 = jax.random.normal(k2, (Cr, C), dtype=jnp.float32) * 0.1

    out = jax.jit(se_layer)(x, w1, w2)
    jax.block_until_ready(out)

    ref = reference_se(x, w1, w2)
    assert out.shape == x.shape
    assert jnp.allclose(out, ref, atol=1e-5, rtol=1e-5), "mismatch vs reference"

    print("KERNEL_OK")
</pallas_src>

<mosaic_0001>
module attributes {stable_mosaic.version = 11 : i64} {
  func.func @_pool_kernel(%arg0: i32, %arg1: i32, %arg2: i32, %arg3: memref<1x64x256xf32, #tpu.memory_space<vmem>>, %arg4: memref<1x64x1xf32, #tpu.memory_space<vmem>>) attributes {dimension_semantics = [#tpu.dimension_semantics<parallel>, #tpu.dimension_semantics<parallel>, #tpu.dimension_semantics<arbitrary>], iteration_bounds = array<i64: 2, 1, 1>, scalar_prefetch = 0 : i64, scratch_operands = 0 : i64, tpu.core_type = #tpu.core_type<tc>, window_params = [{transform_indices = @transform_0, window_bounds = array<i64: 1, 64, 256>}, {transform_indices = @transform_1, window_bounds = array<i64: 1, 64, 1>}]} {
    %c0_i32 = arith.constant 0 : i32
    %0 = arith.cmpi eq, %arg2, %c0_i32 : i32
    %1 = arith.extui %0 : i1 to i32
    %c0_i32_0 = arith.constant 0 : i32
    %2 = arith.cmpi ne, %1, %c0_i32_0 : i32
    scf.if %2 {
      %cst_11 = arith.constant 0.000000e+00 : f32
      %12 = vector.broadcast %cst_11 : f32 to vector<1x64x1xf32>
      %c0_12 = arith.constant 0 : index
      %c0_13 = arith.constant 0 : index
      %c0_14 = arith.constant 0 : index
      %13 = vector.load %arg4[%c0_12, %c0_13, %c0_14] : memref<1x64x1xf32, #tpu.memory_space<vmem>>, vector<1x64x1xf32>
      tpu.vector_store %arg4[%c0_12, %c0_13, %c0_14], %12 {strides = array<i32>} : memref<1x64x1xf32, #tpu.memory_space<vmem>>, vector<1x64x1xf32>,
    } else {
    }
    %c0 = arith.constant 0 : index
    %c0_1 = arith.constant 0 : index
    %c0_2 = arith.constant 0 : index
    %3 = vector.load %arg4[%c0, %c0_1, %c0_2] : memref<1x64x1xf32, #tpu.memory_space<vmem>>, vector<1x64x1xf32>
    %c0_3 = arith.constant 0 : index
    %c0_4 = arith.constant 0 : index
    %c0_5 = arith.constant 0 : index
    %4 = vector.load %arg3[%c0_3, %c0_4, %c0_5] : memref<1x64x256xf32, #tpu.memory_space<vmem>>, vector<1x64x256xf32>
    %cst = arith.constant dense<0.000000e+00> : vector<1x64xf32>
    %5 = vector.multi_reduction <add>, %4, %cst [2] : vector<1x64x256xf32> to vector<1x64xf32>
    %6 = vector.shape_cast %5 : vector<1x64xf32> to vector<1x64x1xf32>
    %7 = arith.addf %3, %6 : vector<1x64x1xf32>
    %c0_6 = arith.constant 0 : index
    %c0_7 = arith.constant 0 : index
    %c0_8 = arith.constant 0 : index
    %8 = vector.load %arg4[%c0_6, %c0_7, %c0_8] : memref<1x64x1xf32, #tpu.memory_space<vmem>>, vector<1x64x1xf32>
    tpu.vector_store %arg4[%c0_6, %c0_7, %c0_8], %7 {strides = array<i32>} : memref<1x64x1xf32, #tpu.memory_space<vmem>>, vector<1x64x1xf32>,
    %c0_i32_9 = arith.constant 0 : i32
    %9 = arith.cmpi eq, %arg2, %c0_i32_9 : i32
    %10 = arith.extui %9 : i1 to i32
    %c0_i32_10 = arith.constant 0 : i32
    %11 = arith.cmpi ne, %10, %c0_i32_10 : i32
    scf.if %11 {
      %c0_11 = arith.constant 0 : index
      %c0_12 = arith.constant 0 : index
      %c0_13 = arith.constant 0 : index
      %12 = vector.load %arg4[%c0_11, %c0_12, %c0_13] : memref<1x64x1xf32, #tpu.memory_space<vmem>>, vector<1x64x1xf32>
      %cst_14 = arith.constant 3.906250e-03 : f32
      %13 = vector.broadcast %cst_14 : f32 to vector<1x64x1xf32>
      %14 = arith.mulf %12, %13 : vector<1x64x1xf32>
      %c0_15 = arith.constant 0 : index
      %c0_16 = arith.constant 0 : index
      %c0_17 = arith.constant 0 : index
      %15 = vector.load %arg4[%c0_15, %c0_16, %c0_17] : memref<1x64x1xf32, #tpu.memory_space<vmem>>, vector<1x64x1xf32>
      tpu.vector_store %arg4[%c0_15, %c0_16, %c0_17], %14 {strides = array<i32>} : memref<1x64x1xf32, #tpu.memory_space<vmem>>, vector<1x64x1xf32>,
    } else {
    }
    return
  }
  func.func @transform_0(%arg0: i32, %arg1: i32, %arg2: i32) -> (i32, i32, i32) {
    %c0_i32 = arith.constant 0 : i32
    return %arg0, %arg1, %arg2 : i32, i32, i32
  }
  func.func @transform_1(%arg0: i32, %arg1: i32, %arg2: i32) -> (i32, i32, i32) {
    %c0_i32 = arith.constant 0 : i32
    %c0_i32_0 = arith.constant 0 : i32
    return %arg0, %arg1, %c0_i32 : i32, i32, i32
  }
}

module attributes {stable_mosaic.version = 11 : i64} {
  func.func @_scale_kernel(%arg0: i32, %arg1: i32, %arg2: i32, %arg3: memref<1x64x256xf32, #tpu.memory_space<vmem>>, %arg4: memref<1x64x1xf32, #tpu.memory_space<vmem>>, %arg5: memref<1x64x256xf32, #tpu.memory_space<vmem>>) attributes {dimension_semantics = [#tpu.dimension_semantics<parallel>, #tpu.dimension_semantics<parallel>, #tpu.dimension_semantics<parallel>], iteration_bounds = array<i64: 2, 1, 1>, scalar_prefetch = 0 : i64, scratch_operands = 0 : i64, tpu.core_type = #tpu.core_type<tc>, window_params = [{transform_indices = @transform_0, window_bounds = array<i64: 1, 64, 256>}, {transform_indices = @transform_1, window_bounds = array<i64: 1, 64, 1>}, {transform_indices = @transform_2, window_bounds = array<i64: 1, 64, 256>}]} {
    %c0 = arith.constant 0 : index
    %c0_0 = arith.constant 0 : index
    %c0_1 = arith.constant 0 : index
    %0 = vector.load %arg3[%c0, %c0_0, %c0_1] : memref<1x64x256xf32, #tpu.memory_space<vmem>>, vector<1x64x256xf32>
    %c0_2 = arith.constant 0 : index
    %c0_3 = arith.constant 0 : index
    %c0_4 = arith.constant 0 : index
    %1 = vector.load %arg4[%c0_2, %c0_3, %c0_4] : memref<1x64x1xf32, #tpu.memory_space<vmem>>, vector<1x64x1xf32>
    %2 = vector.broadcast %1 : vector<1x64x1xf32> to vector<1x64x256xf32>
    %3 = arith.mulf %0, %2 : vector<1x64x256xf32>
    %c0_5 = arith.constant 0 : index
    %c0_6 = arith.constant 0 : index
    %c0_7 = arith.constant 0 : index
    %4 = vector.load %arg5[%c0_5, %c0_6, %c0_7] : memref<1x64x256xf32, #tpu.memory_space<vmem>>, vector<1x64x256xf32>
    tpu.vector_store %arg5[%c0_5, %c0_6, %c0_7], %3 {strides = array<i32>} : memref<1x64x256xf32, #tpu.memory_space<vmem>>, vector<1x64x256xf32>,
    return
  }
  func.func @transform_0(%arg0: i32, %arg1: i32, %arg2: i32) -> (i32, i32, i32) {
    %c0_i32 = arith.constant 0 : i32
    return %arg0, %arg1, %arg2 : i32, i32, i32
  }
  func.func @transform_1(%arg0: i32, %arg1: i32, %arg2: i32) -> (i32, i32, i32) {
    %c0_i32 = arith.constant 0 : i32
    %c0_i32_0 = arith.constant 0 : i32
    return %arg0, %arg1, %c0_i32 : i32, i32, i32
  }
  func.func @transform_2(%arg0: i32, %arg1: i32, %arg2: i32) -> (i32, i32, i32) {
    %c0_i32 = arith.constant 0 : i32
    return %arg0, %arg1, %arg2 : i32, i32, i32
  }
}

</mosaic_0001>

<bundles_post_ra>
// kernel: se_layer.2
= control target key start
LH: loop header
LB: loop body
LE: loop exit
PB: predicated region body
PF: predicated region fallthrough
CT: control target
= control target key end

     0   :  { %s456_s6 = smov 0   ;;  %s458_s7 = smov 0   ;;  %s573_s0 = inlined_call_operand.vmem [shape: f32[2,64,256], index: 0, kind: input, shape index: {}]   ;;  %s574_s1 = inlined_call_operand.vmem [shape: f32[2,64,1], index: 1, kind: output, shape index: {}]  }
   0x1   :  { %s460_s8 = smov 0  }
   0x2 LB: > { %s30_s9 = sadd.s32 1, %s439_s7  ;;  %p387_p0 = scmp.ge.s32.totalorder %s443_s8, 1  ;;  %s443_s8 = sphi %s460_s8, %s11_s8   ;;  %s439_s7 = sphi %s458_s7, %s576_s7   ;;  %s435_s6 = sphi %s456_s6, %s575_s6  }
   0x3   : > { %p32_p1 = scmp.ge.s32.totalorder %s30_s9, 2  ;;  %p123_p2 = scmp.lt.s32.totalorder %s443_s8, 3 }
   0x5   : > { %s578_s9 = smov (%p32_p1, %s30_s9), 0  ;;  %p124_p3 = pnand %p387_p0, %p123_p2 }
   0x6   : > { %p158_p4 = scmp.lt.s32.totalorder (!%p124_p3), %s435_s6, 1  ;;  %vm186_vm0 = vcmask (!%p124_p3), 7168   ;;  %v445_v3 = vmov (!%p124_p3), 0.0  }
   0x7   : > { %127 = sbr.rel (%p124_p3) target bundleno = 188 (0xbc), region = 24 }
   0xe   : > { %s580_s6 = smov (!%p158_p4, %s435_s6), 1 }
   0xf   : > { %s394_s10 = sshll.u32 %s580_s6, 7  ;;  %s395_s11 = sshll.u32 %s580_s6, 6 }
  0x10   : > { %s477_s14 = scalar_lea.vmem %s573_s0, %s394_s10  ;;  %s482_s17 = scalar_lea.vmem %s574_s1, %s395_s11 }
  0x11   : > { %v207_v0 = vld [vmem:[%s477_s14 + $0x20] sm:$0xff]  ;;  %v208_v1 = vld [vmem:[%s477_s14 + $0x28] sm:$0xff]  ;;  %189 = vst.msk [vmem:[%s482_s17 + $0x10] sm:$0xff] %vm186_vm0, %v445_v3  ;;  %187 = vst.msk [vmem:[%s482_s17] sm:$0xff] %vm186_vm0, %v445_v3 }
  0x12   : > { %v203_v2 = vld [vmem:[%s477_s14] sm:$0xff]  ;;  %188 = vst.msk [vmem:[%s482_s17 + $0x8] sm:$0xff] %vm186_vm0, %v445_v3  ;;  %190 = vst.msk [vmem:[%s482_s17 + $0x18] sm:$0xff] %vm186_vm0, %v445_v3  ;;  %v225_v4 = vadd.f32 %v208_v1, %v207_v0  ;;  %v204_v5 = vld [vmem:[%s477_s14 + $0x8] sm:$0xff] }
  0x13   : > { %191 = vst.msk [vmem:[%s482_s17 + $0x20] sm:$0xff] %vm186_vm0, %v445_v3  ;;  %192 = vst.msk [vmem:[%s482_s17 + $0x28] sm:$0xff] %vm186_vm0, %v445_v3  ;;  %v209_v6 = vld [vmem:[%s477_s14 + $0x30] sm:$0xff]  ;;  %v210_v7 = vld [vmem:[%s477_s14 + $0x38] sm:$0xff]  ;;  %v219_v8 = vadd.f32 %v204_v5, %v203_v2 }
  0x14   : > { %193 = vst.msk [vmem:[%s482_s17 + $0x30] sm:$0xff] %vm186_vm0, %v445_v3  ;;  %194 = vst.msk [vmem:[%s482_s17 + $0x38] sm:$0xff] %vm186_vm0, %v445_v3  ;;  %v205_v9 = vld [vmem:[%s477_s14 + $0x10] sm:$0xff]  ;;  %v206_v10 = vld [vmem:[%s477_s14 + $0x18] sm:$0xff]  ;;  %226 = vadd.xlane.f32.xlu1 %v225_v4  ;;  %v228_v11 = vadd.f32 %v210_v7, %v209_v6 }
  0x15   : > { %220 = vadd.xlane.f32.xlu0 %v219_v8  ;;  %v222_v12 = vadd.f32 %v206_v10, %v205_v9  ;;  %v213_v13 = vld [vmem:[%s477_s14 + $0x50] sm:$0xff]  ;;  %v214_v14 = vld [vmem:[%s477_s14 + $0x58] sm:$0xff]  ;;  %v211_v15 = vld [vmem:[%s477_s14 + $0x40] sm:$0xff] }
  0x16   : > { %v212_v16 = vld [vmem:[%s477_s14 + $0x48] sm:$0xff]  ;;  %v234_v17 = vadd.f32 %v214_v14, %v213_v13  ;;  %v217_v19 = vld [vmem:[%s477_s14 + $0x70] sm:$0xff]  ;;  %v218_v20 = vld [vmem:[%s477_s14 + $0x78] sm:$0xff] }
  0x17   : > { %v231_v18 = vadd.f32 %v212_v16, %v211_v15  ;;  %v215_v21 = vld [vmem:[%s477_s14 + $0x60] sm:$0xff]  ;;  %v216_v22 = vld [vmem:[%s477_s14 + $0x68] sm:$0xff]  ;;  %v240_v23 = vadd.f32 %v218_v20, %v217_v19 }
  0x18   : > { %229 = vadd.xlane.f32.xlu1 %v228_v11  ;;  %v237_v24 = vadd.f32 %v216_v22, %v215_v21  ;;  %v197_v25 = vld [vmem:[%s482_s17 + $0x10] sm:$0xff]  ;;  %v195_v26 = vld [vmem:[%s482_s17] sm:$0xff] }
  0x19   : > { %223 = vadd.xlane.f32.xlu0 %v222_v12  ;;  %v198_v31 = vld [vmem:[%s482_s17 + $0x18] sm:$0xff]  ;;  %v196_v32 = vld [vmem:[%s482_s17 + $0x8] sm:$0xff] }
  0x1a   : > { %v200_v37 = vld [vmem:[%s482_s17 + $0x28] sm:$0xff]  ;;  %v199_v38 = vld [vmem:[%s482_s17 + $0x20] sm:$0xff] }
  0x1b   : > { %v202_v44 = vld [vmem:[%s482_s17 + $0x38] sm:$0xff]  ;;  %v201_v47 = vld [vmem:[%s482_s17 + $0x30] sm:$0xff] }
  0x1c   : > { %235 = vadd.xlane.f32.xlu1 %v234_v17 }
  0x1d   : > { %232 = vadd.xlane.f32.xlu0 %v231_v18 }
  0x20   : > { %241 = vadd.xlane.f32.xlu1 %v240_v23 }
  0x21   : > { %238 = vadd.xlane.f32.xlu0 %v237_v24 }
  0xa1   : > { %v227_v27 = vpop.xlane.xlu1 %226 }
  0xa2   : > { %v245_v28 = vadd.f32 %v227_v27, %v197_v25  ;;  %v221_v29 = vpop.xlane.xlu0 %220 }
  0xa3   : > { %v243_v30 = vadd.f32 %v221_v29, %v195_v26 }
  0xa4   : > { %254 = vst.msk [vmem:[%s482_s17 + $0x10] sm:$0xff] %vm186_vm0, %v245_v28 }
  0xa5   : > { %252 = vst.msk [vmem:[%s482_s17] sm:$0xff] %vm186_vm0, %v243_v30  ;;  %v230_v33 = vpop.xlane.xlu1 %229 }
  0xa6   : > { %v246_v34 = vadd.f32 %v230_v33, %v198_v31  ;;  %v224_v35 = vpop.xlane.xlu0 %223 }
  0xa7   : > { %v244_v36 = vadd.f32 %v224_v35, %v196_v32 }
  0xa8   : > { %255 = vst.msk [vmem:[%s482_s17 + $0x18] sm:$0xff] %vm186_vm0, %v246_v34 }
  0xa9   : > { %253 = vst.msk [vmem:[%s482_s17 + $0x8] sm:$0xff] %vm186_vm0, %v244_v36  ;;  %v236_v39 = vpop.xlane.xlu1 %235 }
  0xaa   : > { %v248_v40 = vadd.f32 %v236_v39, %v200_v37  ;;  %v233_v41 = vpop.xlane.xlu0 %232 }
  0xab   : > { %v265_v42 = vld [vmem:[%s482_s17 + $0x10] sm:$0xff]  ;;  %v247_v43 = vadd.f32 %v233_v41, %v199_v38 }
  0xac   : > { %v273_v45 = vmul.f32 0.00390625, %v265_v42  ;;  %v263_v46 = vld [vmem:[%s482_s17] sm:$0xff]  ;;  %257 = vst.msk [vmem:[%s482_s17 + $0x28] sm:$0xff] %vm186_vm0, %v248_v40 }
  0xad   : > { %v271_v48 = vmul.f32 0.00390625, %v263_v46  ;;  %256 = vst.msk [vmem:[%s482_s17 + $0x20] sm:$0xff] %vm186_vm0, %v247_v43  ;;  %v242_v49 = vpop.xlane.xlu1 %241 }
  0xae   : > { %281 = vst.msk [vmem:[%s482_s17 + $0x10] sm:$0xff] %vm186_vm0, %v273_v45  ;;  %v250_v50 = vadd.f32 %v242_v49, %v202_v44  ;;  %v239_v51 = vpop.xlane.xlu0 %238 }
  0xaf   : > { %279 = vst.msk [vmem:[%s482_s17] sm:$0xff] %vm186_vm0, %v271_v48  ;;  %v266_v52 = vld [vmem:[%s482_s17 + $0x18] sm:$0xff]  ;;  %v249_v53 = vadd.f32 %v239_v51, %v201_v47 }
  0xb0   : > { %v274_v54 = vmul.f32 0.00390625, %v266_v52  ;;  %v264_v55 = vld [vmem:[%s482_s17 + $0x8] sm:$0xff]  ;;  %259 = vst.msk [vmem:[%s482_s17 + $0x38] sm:$0xff] %vm186_vm0, %v250_v50 }
  0xb1   : > { %v272_v56 = vmul.f32 0.00390625, %v264_v55  ;;  %258 = vst.msk [vmem:[%s482_s17 + $0x30] sm:$0xff] %vm186_vm0, %v249_v53 }
  0xb2   : > { %282 = vst.msk [vmem:[%s482_s17 + $0x18] sm:$0xff] %vm186_vm0, %v274_v54 }
  0xb3   : > { %280 = vst.msk [vmem:[%s482_s17 + $0x8] sm:$0xff] %vm186_vm0, %v272_v56  ;;  %v268_v57 = vld [vmem:[%s482_s17 + $0x28] sm:$0xff] }
  0xb4   : > { %v276_v58 = vmul.f32 0.00390625, %v268_v57  ;;  %v267_v59 = vld [vmem:[%s482_s17 + $0x20] sm:$0xff] }
  0xb5   : > { %v275_v60 = vmul.f32 0.00390625, %v267_v59 }
  0xb6   : > { %284 = vst.msk [vmem:[%s482_s17 + $0x28] sm:$0xff] %vm186_vm0, %v276_v58 }
  0xb7   : > { %283 = vst.msk [vmem:[%s482_s17 + $0x20] sm:$0xff] %vm186_vm0, %v275_v60  ;;  %v270_v61 = vld [vmem:[%s482_s17 + $0x38] sm:$0xff] }
  0xb8   : > { %v278_v62 = vmul.f32 0.00390625, %v270_v61  ;;  %v269_v63 = vld [vmem:[%s482_s17 + $0x30] sm:$0xff] }
  0xb9   : > { %v277_v0 = vmul.f32 0.00390625, %v269_v63 }
  0xba   : > { %286 = vst.msk [vmem:[%s482_s17 + $0x38] sm:$0xff] %vm186_vm0, %v278_v62 }
  0xbb   : > { %285 = vst.msk [vmem:[%s482_s17 + $0x30] sm:$0xff] %vm186_vm0, %v277_v0 }
  0xbc PF: > { %s11_s8 = sadd.s32 1, %s443_s8   ;;  %s575_s6 = smov %s439_s7 }
  0xbd   : > { %p8_p5 = scmp.ge.s32.totalorder %s11_s8, 4   ;;  %s576_s7 = smov %s578_s9 }
  0xbf   :  { %10 = sbr.rel (!%p8_p5) target bundleno = 2 (0x2), region = 62 }

// kernel: se_layer.3
= control target key start
LH: loop header
LB: loop body
LE: loop exit
PB: predicated region body
PF: predicated region fallthrough
CT: control target
= control target key end

     0   :  { %s570_s9 = smov 0   ;;  %s572_s10 = smov 0   ;;  %s642_s0 = inlined_call_operand.vmem [shape: f32[2,64,256], index: 0, kind: input, shape index: {}]   ;;  %s643_s1 = inlined_call_operand.vmem [shape: f32[2,64,1], index: 1, kind: input, shape index: {}]   ;;  %s644_s2 = inlined_call_operand.vmem [shape: f32[2,64,256], index: 2, kind: output, shape index: {}]  }
   0x1   :  { %s574_s11 = smov 0  }
   0x2 LB: > { %s31_s12 = sadd.s32 1, %s548_s10  ;;  %p491_p0 = scmp.ge.s32.totalorder %s552_s11, 1  ;;  %s552_s11 = sphi %s574_s11, %s12_s11   ;;  %s548_s10 = sphi %s572_s10, %s646_s10   ;;  %s544_s9 = sphi %s570_s9, %s645_s9  }
   0x3   : > { %p33_p1 = scmp.ge.s32.totalorder %s31_s12, 2  ;;  %p167_p2 = scmp.lt.s32.totalorder %s552_s11, 3 }
   0x5   : > { %s648_s12 = smov (%p33_p1, %s31_s12), 0  ;;  %p168_p3 = pnand %p491_p0, %p167_p2 }
   0x6   : > { %p218_p4 = scmp.lt.s32.totalorder (!%p168_p3), %s544_s9, 1  ;;  %v554_v0 = vmov (!%p168_p3), 0  }
   0x7   : > { %171 = sbr.rel (%p168_p3) target bundleno = 162 (0xa2), region = 28  ;;  %529 = vset.pattern.permute.xlu1 (!%p168_p3), %v554_v0  ;;  %528 = vset.pattern.permute.xlu0 (!%p168_p3), %v554_v0 }
   0xe   : > { %s650_s9 = smov (!%p218_p4, %s544_s9), 1 }
   0xf   : > { %s501_s13 = sshll.u32 %s650_s9, 6  ;;  %s500_s17 = sshll.u32 %s650_s9, 7 }
  0x10   : > { %s240_s16 = scalar_lea.vmem %s643_s1, %s501_s13  ;;  %s594_s20 = scalar_lea.vmem %s642_s0, %s500_s17 }
  0x11   : > { %v276_v1 = vld [vmem:[%s240_s16 + $0x10] sm:$0xff]  ;;  %v274_v2 = vld [vmem:[%s240_s16] sm:$0xff]  ;;  %v277_v3 = vld [vmem:[%s240_s16 + $0x18] sm:$0xff]  ;;  %s603_s23 = scalar_lea.vmem %s644_s2, %s500_s17 }
  0x12   : > { %294 = vperm.xlu1 %529, %v276_v1   ;;  %284 = vperm.xlu0 %528, %v274_v2   ;;  %v275_v4 = vld [vmem:[%s240_s16 + $0x8] sm:$0xff]  ;;  %v278_v6 = vld [vmem:[%s240_s16 + $0x20] sm:$0xff]  ;;  %v281_v7 = vld [vmem:[%s240_s16 + $0x38] sm:$0xff] }
  0x13   : > { %v279_v5 = vld [vmem:[%s240_s16 + $0x28] sm:$0xff]  ;;  %v280_v8 = vld [vmem:[%s240_s16 + $0x30] sm:$0xff]  ;;  %v262_v9 = vld [vmem:[%s594_s20 + $0x20] sm:$0xff] }
  0x14   : > { %v263_v10 = vld [vmem:[%s594_s20 + $0x28] sm:$0xff]  ;;  %v258_v11 = vld [vmem:[%s594_s20] sm:$0xff]  ;;  %v264_v19 = vld [vmem:[%s594_s20 + $0x30] sm:$0xff] }
  0x15   : > { %v259_v12 = vld [vmem:[%s594_s20 + $0x8] sm:$0xff]  ;;  %v265_v20 = vld [vmem:[%s594_s20 + $0x38] sm:$0xff]  ;;  %v260_v21 = vld [vmem:[%s594_s20 + $0x10] sm:$0xff] }
  0x16   : > { %299 = vperm.xlu1 %529, %v277_v3   ;;  %289 = vperm.xlu0 %528, %v275_v4   ;;  %v261_v22 = vld [vmem:[%s594_s20 + $0x18] sm:$0xff]  ;;  %v268_v29 = vld [vmem:[%s594_s20 + $0x50] sm:$0xff]  ;;  %v266_v31 = vld [vmem:[%s594_s20 + $0x40] sm:$0xff] }
  0x17   : > { %v269_v30 = vld [vmem:[%s594_s20 + $0x58] sm:$0xff]  ;;  %v267_v32 = vld [vmem:[%s594_s20 + $0x48] sm:$0xff]  ;;  %v272_v39 = vld [vmem:[%s594_s20 + $0x70] sm:$0xff] }
  0x18   : > { %v273_v40 = vld [vmem:[%s594_s20 + $0x78] sm:$0xff]  ;;  %v270_v41 = vld [vmem:[%s594_s20 + $0x60] sm:$0xff]  ;;  %v271_v42 = vld [vmem:[%s594_s20 + $0x68] sm:$0xff] }
  0x1a   : > { %309 = vperm.xlu1 %529, %v279_v5   ;;  %304 = vperm.xlu0 %528, %v278_v6  }
  0x1e   : > { %319 = vperm.xlu1 %529, %v281_v7   ;;  %314 = vperm.xlu0 %528, %v280_v8  }
  0x91   : > { %v295_v13 = vpop.permute.xlu1 %294  ;;  %v285_v14 = vpop.permute.xlu0 %284 }
  0x92   : > { %v326_v15 = vmul.f32 %v295_v13, %v262_v9  ;;  %v327_v16 = vmul.f32 %v295_v13, %v263_v10  ;;  %v322_v17 = vmul.f32 %v285_v14, %v258_v11  ;;  %v323_v18 = vmul.f32 %v285_v14, %v259_v12 }
  0x94   : > { %342 = vst [vmem:[%s603_s23 + $0x20] sm:$0xff] %v326_v15  ;;  %343 = vst [vmem:[%s603_s23 + $0x28] sm:$0xff] %v327_v16 }
  0x95   : > { %338 = vst [vmem:[%s603_s23] sm:$0xff] %v322_v17  ;;  %339 = vst [vmem:[%s603_s23 + $0x8] sm:$0xff] %v323_v18  ;;  %v300_v23 = vpop.permute.xlu1 %299  ;;  %v290_v24 = vpop.permute.xlu0 %289 }
  0x96   : > { %v328_v25 = vmul.f32 %v300_v23, %v264_v19  ;;  %v329_v26 = vmul.f32 %v300_v23, %v265_v20  ;;  %v324_v27 = vmul.f32 %v290_v24, %v260_v21  ;;  %v325_v28 = vmul.f32 %v290_v24, %v261_v22 }
  0x98   : > { %344 = vst [vmem:[%s603_s23 + $0x30] sm:$0xff] %v328_v25  ;;  %345 = vst [vmem:[%s603_s23 + $0x38] sm:$0xff] %v329_v26 }
  0x99   : > { %340 = vst [vmem:[%s603_s23 + $0x10] sm:$0xff] %v324_v27  ;;  %341 = vst [vmem:[%s603_s23 + $0x18] sm:$0xff] %v325_v28  ;;  %v310_v33 = vpop.permute.xlu1 %309  ;;  %v305_v34 = vpop.permute.xlu0 %304 }
  0x9a   : > { %v332_v35 = vmul.f32 %v310_v33, %v268_v29  ;;  %v333_v36 = vmul.f32 %v310_v33, %v269_v30  ;;  %v330_v37 = vmul.f32 %v305_v34, %v266_v31  ;;  %v331_v38 = vmul.f32 %v305_v34, %v267_v32 }
  0x9c   : > { %348 = vst [vmem:[%s603_s23 + $0x50] sm:$0xff] %v332_v35  ;;  %349 = vst [vmem:[%s603_s23 + $0x58] sm:$0xff] %v333_v36 }
  0x9d   : > { %346 = vst [vmem:[%s603_s23 + $0x40] sm:$0xff] %v330_v37  ;;  %347 = vst [vmem:[%s603_s23 + $0x48] sm:$0xff] %v331_v38  ;;  %v320_v43 = vpop.permute.xlu1 %319  ;;  %v315_v44 = vpop.permute.xlu0 %314 }
  0x9e   : > { %v336_v45 = vmul.f32 %v320_v43, %v272_v39  ;;  %v337_v46 = vmul.f32 %v320_v43, %v273_v40  ;;  %v334_v47 = vmul.f32 %v315_v44, %v270_v41  ;;  %v335_v48 = vmul.f32 %v315_v44, %v271_v42 }
  0xa0   : > { %352 = vst [vmem:[%s603_s23 + $0x70] sm:$0xff] %v336_v45  ;;  %353 = vst [vmem:[%s603_s23 + $0x78] sm:$0xff] %v337_v46 }
  0xa1   : > { %350 = vst [vmem:[%s603_s23 + $0x60] sm:$0xff] %v334_v47  ;;  %351 = vst [vmem:[%s603_s23 + $0x68] sm:$0xff] %v335_v48 }
  0xa2 PF: > { %s12_s11 = sadd.s32 1, %s552_s11   ;;  %s645_s9 = smov %s548_s10 }
  0xa3   : > { %p9_p5 = scmp.ge.s32.totalorder %s12_s11, 4   ;;  %s646_s10 = smov %s648_s12 }
  0xa5   :  { %11 = sbr.rel (!%p9_p5) target bundleno = 2 (0x2), region = 61 }

</bundles_post_ra>
